<compile_context>
chip_gen: v7x
topology: tpu7x:2x2x1
jax: 0.10.0
libtpu: 0.0.40
codegen_flags: <defaults>
</compile_context>

<pallas_src>
import functools

import jax
import jax.numpy as jnp
from jax.experimental import pallas as pl
from jax.experimental.pallas import tpu as pltpu

_SUBLANE = 8
_LANE = 128

_TN_CANDIDATES = (8192, 4096, 2048, 1024, 512, 256, 128)
_TK_CANDIDATES = (4096, 2048, 1024, 512, 256, 128)


def _round_up(x, m):
    return ((x + m - 1) // m) * m


@functools.lru_cache(maxsize=None)
def _vmem_budget_limit():
    """Generation-aware (budget, vmem_limit) in bytes.

    v5e/v6e have 128 MiB VMEM, v7x only 64 MiB per TensorCore; derive both
    from the actual chip instead of hard-coding the smallest case everywhere.
    """
    try:
        cap = int(pltpu.get_tpu_info().vmem_capacity_bytes)
    except Exception:
        cap = 64 * 1024 * 1024  # conservative fallback: v7x per-TC VMEM
    budget = int(cap * 0.60)    # working-set budget used for tile picking
    limit = int(cap * 0.80)     # Mosaic scoped-VMEM limit (headroom for scratch)
    return budget, limit


def _pick_resident_tn(in_features, out_p, n, in_itemsize, out_itemsize, budget):
    """Largest lane tile whose working set fits, with W fully VMEM-resident.

    W is counted twice so fitting never depends on the Buffered(1) hint; the
    output double buffer is counted at the OUTPUT itemsize (f32 out with bf16
    inputs is the common mixed case). Returns None if W cannot stay resident.
    """
    fixed = 2 * out_p * in_features * in_itemsize + 2 * out_p * 4
    if fixed > budget:
        return None
    cap = _round_up(n, _LANE)
    for tn in sorted({min(t, cap) for t in _TN_CANDIDATES}, reverse=True):
        need = (fixed
                + 2 * in_features * tn * in_itemsize   # x tile double buffer
                + 2 * out_p * tn * out_itemsize)       # out tile double buffer
        if need <= budget:
            return tn
    return None


def _pick_ktiled_tiles(in_features, out_p, n, in_itemsize, out_itemsize, budget):
    """Tile sizes for the K-streaming path (W too large to keep resident)."""
    ncap = _round_up(n, _LANE)
    kcap = _round_up(in_features, _LANE)
    for tn in sorted({min(t, ncap) for t in _TN_CANDIDATES}, reverse=True):
        for tk in sorted({min(t, kcap) for t in _TK_CANDIDATES}, reverse=True):
            need = (out_p * tn * 4                    # f32 accumulator scratch
                    + 2 * out_p * tn * out_itemsize   # out tile double buffer
                    + 2 * out_p * tk * in_itemsize    # W tile double buffer
                    + 2 * tk * tn * in_itemsize       # x tile double buffer
                    + 2 * out_p * 4)                  # bias
            if need <= budget:
                return tn, tk
    return None


def _resident_kernel(w_ref, b_ref, x_ref, o_ref):
    # One MXU pass: resident (padded) weight against one lane tile of x,
    # f32 accumulation, f32 bias broadcast along the lane axis.
    acc = jnp.dot(w_ref[...], x_ref[...], preferred_element_type=jnp.float32)
    o_ref[...] = (acc + b_ref[...]).astype(o_ref.dtype)


def _ktiled_kernel(w_ref, b_ref, x_ref, o_ref, acc_ref, *, k_rem):
    # K-streaming matmul with an f32 VMEM accumulator; reduction axis is the
    # last grid axis, accumulator init on k==0, bias + store on k==last.
    k = pl.program_id(1)
    nk = pl.num_programs(1)

    @pl.when(k == 0)
    def _init():
        acc_ref[...] = jnp.zeros_like(acc_ref)

    w = w_ref[...]
    x = x_ref[...]
    if k_rem:
        # Ragged last K block: the un-read tail of the VMEM buffers is stale
        # (possibly NaN); zero it on BOTH operands so it cannot poison the
        # accumulator (NaN * 0 == NaN, so one-sided masking is not enough).
        tk = x.shape[0]
        valid = jnp.where(k == nk - 1, k_rem, tk)
        col = jax.lax.broadcasted_iota(jnp.int32, w.shape, 1)
        w = jnp.where(col < valid, w, jnp.zeros_like(w))
        row = jax.lax.broadcasted_iota(jnp.int32, x.shape, 0)
        x = jnp.where(row < valid, x, jnp.zeros_like(x))

    acc_ref[...] += jnp.dot(w, x, preferred_element_type=jnp.float32)

    @pl.when(k == nk - 1)
    def _finalize():
        o_ref[...] = (acc_ref[...] + b_ref[...]).astype(o_ref.dtype)


def prepare_params(w, b, *, compute_dtype=None):
    """One-time parameter prep, hoisted out of the per-call path.

    Optionally casts W to the compute dtype (e.g. bf16) and pads out_features
    to the sublane pack of that dtype (16 for bf16, 8 for f32) so stores are
    layout-aligned. Returns (w_padded, bias_2d_f32, out_features).
    """
    out_features, _ = w.shape
    if compute_dtype is not None:
        w = w.astype(compute_dtype)
    sub = 16 if jnp.dtype(w.dtype).itemsize == 2 else _SUBLANE
    out_p = _round_up(out_features, sub)
    b = b.astype(jnp.float32)  # bias epilogue stays f32 (v5e VPU has no bf16)
    if out_p != out_features:
        w = jnp.pad(w, ((0, out_p - out_features), (0, 0)))
        b = jnp.pad(b, (0, out_p - out_features))
    return w, b.reshape(out_p, 1), out_features


@functools.partial(
    jax.jit,
    static_argnames=("out_features", "out_dtype", "tn", "tk", "use_ktiled",
                     "vmem_limit"),
)
def _transposed_linear_impl(x, w, b2d, *, out_features, out_dtype, tn, tk,
                            use_ktiled, vmem_limit):
    in_features, n = x.shape
    out_p = w.shape[0]
    if x.dtype != w.dtype:
        # compute_dtype != input dtype: one per-call cast of x (pass x already
        # in the compute dtype to avoid this HBM copy).
        x = x.astype(w.dtype)

    in_itemsize = jnp.dtype(w.dtype).itemsize
    out_itemsize = jnp.dtype(out_dtype).itemsize
    grid_n = pl.cdiv(n, tn)

    cost = pl.CostEstimate(
        flops=2 * out_p * in_features * n,
        transcendentals=0,
        bytes_accessed=(in_itemsize * (out_p * in_features + in_features * n)
                        + 4 * out_p + out_itemsize * out_p * n),
    )

    if not use_ktiled:
        # Resident-W path: W / bias fetched once (constant index map, single
        # buffered); x / y streamed in lane tiles with no wrapper-side padding
        # (boundary block uses masked stores, all other tiles are lane-dense).
        if tn <= 256 and grid_n > 2:
            # Small tiles expose per-step DMA issue latency; add pipeline depth.
            x_spec = pl.BlockSpec((in_features, tn), lambda j: (0, j),
                                  pipeline_mode=pl.Buffered(3))
        else:
            x_spec = pl.BlockSpec((in_features, tn), lambda j: (0, j))
        y = pl.pallas_call(
            _resident_kernel,
            out_shape=jax.ShapeDtypeStruct((out_p, n), out_dtype),
            grid_spec=pltpu.PrefetchScalarGridSpec(
                num_scalar_prefetch=0,
                grid=(grid_n,),
                in_specs=[
                    pl.BlockSpec((out_p, in_features), lambda j: (0, 0),
                                 pipeline_mode=pl.Buffered(1)),
                    pl.BlockSpec((out_p, 1), lambda j: (0, 0),
                                 pipeline_mode=pl.Buffered(1)),
                    x_spec,
                ],
                out_specs=pl.BlockSpec((out_p, tn), lambda j: (0, j)),
            ),
            compiler_params=pltpu.CompilerParams(
                # TODO(synk): on v7x megacore, "parallel" duplicates the resident
                # W per TensorCore; tens-of-MiB weights should use the K-tiled
                # path (or a VMEM_SHARED staging copy) instead.
                dimension_semantics=("parallel",),
                vmem_limit_bytes=vmem_limit,
            ),
            cost_estimate=cost,
        )(w, b2d, x)
    else:
        # K-tiled streaming path for weights too large to keep VMEM-resident.
        grid_k = pl.cdiv(in_features, tk)
        k_rem = in_features % tk
        y = pl.pallas_call(
            functools.partial(_ktiled_kernel, k_rem=k_rem),
            out_shape=jax.ShapeDtypeStruct((out_p, n), out_dtype),
            grid_spec=pltpu.PrefetchScalarGridSpec(
                num_scalar_prefetch=0,
                grid=(grid_n, grid_k),          # reduction axis last
                in_specs=[
                    pl.BlockSpec((out_p, tk), lambda j, k: (0, k)),
                    pl.BlockSpec((out_p, 1), lambda j, k: (0, 0),
                                 pipeline_mode=pl.Buffered(1)),
                    pl.BlockSpec((tk, tn), lambda j, k: (k, j)),
                ],
                out_specs=pl.BlockSpec((out_p, tn), lambda j, k: (0, j)),
                scratch_shapes=[pltpu.VMEM((out_p, tn), jnp.float32)],
            ),
            compiler_params=pltpu.CompilerParams(
                dimension_semantics=("parallel", "arbitrary"),
                vmem_limit_bytes=vmem_limit,
            ),
            cost_estimate=cost,
        )(w, b2d, x)

    if out_p != out_features:
        y = y[:out_features]
    return y


def transposed_linear(x, w_p, b2d, out_features, *, out_dtype=None, tn=None,
                      tk=None, force_ktiled=False):
    """y = W @ x + b[:, None]  (== torch: linear(x.t()).t())

    Takes parameters pre-processed by prepare_params() so the per-call path
    never re-pads / re-casts W in HBM.
    """
    in_features, n = x.shape
    out_p, in_w = w_p.shape
    if in_w != in_features:
        raise ValueError("weight in_features does not match x")
    if out_dtype is None:
        out_dtype = x.dtype
    out_dtype = jnp.dtype(out_dtype)

    budget, vmem_limit = _vmem_budget_limit()
    in_itemsize = jnp.dtype(w_p.dtype).itemsize
    out_itemsize = out_dtype.itemsize

    use_ktiled = bool(force_ktiled)
    if not use_ktiled and tn is None:
        tn = _pick_resident_tn(in_features, out_p, n, in_itemsize,
                               out_itemsize, budget)
        if tn is None:
            use_ktiled = True

    if use_ktiled:
        if tn is None or tk is None:
            picked = _pick_ktiled_tiles(in_features, out_p, n, in_itemsize,
                                        out_itemsize, budget)
            if picked is None:
                # TODO(synk): add an out_features (M) grid axis for weights whose
                # single (out_p, 128) tile + accumulator exceed VMEM.
                raise NotImplementedError(
                    "weight too large even for the K-tiled path")
            if tn is None:
                tn = picked[0]
            if tk is None:
                tk = picked[1]
    else:
        tk = 0  # unused in the resident path

    if tn % _LANE != 0 or (use_ktiled and tk % _LANE != 0):
        raise ValueError("tile sizes must be multiples of 128")

    return _transposed_linear_impl(
        x, w_p, b2d,
        out_features=out_features, out_dtype=out_dtype,
        tn=int(tn), tk=int(tk), use_ktiled=use_ktiled, vmem_limit=vmem_limit)


def _ref(x, w, b):
    # Reference: (x.T @ W.T + b).T == W @ x + b[:, None]
    return (x.T @ w.T + b).T


if __name__ == "__main__":
    key = jax.random.PRNGKey(0)

    # --- Test 1: typical small aligned shapes (f32, resident-W path) ----------
    in1, out1, n1 = 32, 16, 256
    k1, k2, k3, key = jax.random.split(key, 4)
    bound = 1.0 / (in1 ** 0.5)
    w1 = jax.random.uniform(k1, (out1, in1), jnp.float32, minval=-bound, maxval=bound)
    b1 = jax.random.uniform(k2, (out1,), jnp.float32, minval=-bound, maxval=bound)
    x1 = jax.random.normal(k3, (in1, n1), jnp.float32)
    p1 = prepare_params(w1, b1)
    y1 = jax.block_until_ready(transposed_linear(x1, *p1))
    assert y1.shape == (out1, n1)
    assert jnp.allclose(y1, _ref(x1, w1, b1), atol=1e-5, rtol=1e-5), "f32 mismatch"

    # --- Test 2: ragged shapes (W sublane pad + ragged-N boundary block) ------
    in2, out2, n2 = 24, 10, 200
    k1, k2, k3, key = jax.random.split(key, 4)
    bound2 = 1.0 / (in2 ** 0.5)
    w2 = jax.random.uniform(k1, (out2, in2), jnp.float32, minval=-bound2, maxval=bound2)
    b2 = jax.random.uniform(k2, (out2,), jnp.float32, minval=-bound2, maxval=bound2)
    x2 = jax.random.normal(k3, (in2, n2), jnp.float32)
    p2 = prepare_params(w2, b2)
    y2 = jax.block_until_ready(transposed_linear(x2, *p2))
    assert y2.shape == (out2, n2)
    assert jnp.allclose(y2, _ref(x2, w2, b2), atol=1e-5, rtol=1e-5), "ragged mismatch"

    # --- Test 3: bf16 compute (f32 MXU accumulation) + bf16 writeback ---------
    p3 = prepare_params(w1, b1, compute_dtype=jnp.bfloat16)
    y3 = jax.block_until_ready(
        transposed_linear(x1.astype(jnp.bfloat16), *p3, out_dtype=jnp.bfloat16))
    assert y3.shape == (out1, n1)
    assert jnp.allclose(y3.astype(jnp.float32), _ref(x1, w1, b1),
                        atol=5e-2, rtol=5e-2), "bf16 mismatch"

    # --- Test 4: K-tiled streaming path (forced; ragged K and N blocks) -------
    in4, out4, n4 = 200, 40, 300
    k1, k2, k3, key = jax.random.split(key, 4)
    bound4 = 1.0 / (in4 ** 0.5)
    w4 = jax.random.uniform(k1, (out4, in4), jnp.float32, minval=-bound4, maxval=bound4)
    b4 = jax.random.uniform(k2, (out4,), jnp.float32, minval=-bound4, maxval=bound4)
    x4 = jax.random.normal(k3, (in4, n4), jnp.float32)
    p4 = prepare_params(w4, b4)
    y4 = jax.block_until_ready(
        transposed_linear(x4, *p4, force_ktiled=True, tn=128, tk=128))
    assert y4.shape == (out4, n4)
    assert jnp.allclose(y4, _ref(x4, w4, b4), atol=1e-4, rtol=1e-4), "ktiled mismatch"

    print("KERNEL_OK")
</pallas_src>

<mosaic_0001>
module attributes {stable_mosaic.version = 11 : i64} {
  func.func @_resident_kernel(%arg0: i32, %arg1: memref<16x32xf32, #tpu.memory_space<vmem>>, %arg2: memref<16x1xf32, #tpu.memory_space<vmem>>, %arg3: memref<32x256xf32, #tpu.memory_space<vmem>>, %arg4: memref<16x256xf32, #tpu.memory_space<vmem>>) attributes {dimension_semantics = [#tpu.dimension_semantics<parallel>], iteration_bounds = array<i64: 1>, scalar_prefetch = 0 : i64, scratch_operands = 0 : i64, tpu.core_type = #tpu.core_type<tc>, window_params = [{pipeline_mode = #tpu.pipeline_mode<synchronous>, transform_indices = @transform_0, window_bounds = array<i64: 16, 32>}, {pipeline_mode = #tpu.pipeline_mode<synchronous>, transform_indices = @transform_1, window_bounds = array<i64: 16, 1>}, {transform_indices = @transform_2, window_bounds = array<i64: 32, 256>}, {transform_indices = @transform_3, window_bounds = array<i64: 16, 256>}]} {
    %c0 = arith.constant 0 : index
    %c0_0 = arith.constant 0 : index
    %0 = vector.load %arg1[%c0, %c0_0] : memref<16x32xf32, #tpu.memory_space<vmem>>, vector<16x32xf32>
    %c0_1 = arith.constant 0 : index
    %c0_2 = arith.constant 0 : index
    %1 = vector.load %arg3[%c0_1, %c0_2] : memref<32x256xf32, #tpu.memory_space<vmem>>, vector<32x256xf32>
    %cst = arith.constant dense<0.000000e+00> : vector<16x256xf32>
    %2 = tpu.matmul %0, %1, %cst {dimension_numbers = #tpu.dot_dimension_numbers<[1], [0], [0], [1], [0, 0, 1, 1], [], []>} : vector<16x32xf32>, vector<32x256xf32>, vector<16x256xf32> -> vector<16x256xf32>
    %c0_3 = arith.constant 0 : index
    %c0_4 = arith.constant 0 : index
    %3 = vector.load %arg2[%c0_3, %c0_4] : memref<16x1xf32, #tpu.memory_space<vmem>>, vector<16x1xf32>
    %4 = vector.broadcast %3 : vector<16x1xf32> to vector<16x256xf32>
    %5 = arith.addf %2, %4 : vector<16x256xf32>
    %c0_5 = arith.constant 0 : index
    %c0_6 = arith.constant 0 : index
    %6 = vector.load %arg4[%c0_5, %c0_6] : memref<16x256xf32, #tpu.memory_space<vmem>>, vector<16x256xf32>
    tpu.vector_store %arg4[%c0_5, %c0_6], %5 {strides = array<i32>} : memref<16x256xf32, #tpu.memory_space<vmem>>, vector<16x256xf32>,
    return
  }
  func.func @transform_0(%arg0: i32) -> (i32, i32) {
    %c0_i32 = arith.constant 0 : i32
    %c0_i32_0 = arith.constant 0 : i32
    %c0_i32_1 = arith.constant 0 : i32
    return %c0_i32, %c0_i32_0 : i32, i32
  }
  func.func @transform_1(%arg0: i32) -> (i32, i32) {
    %c0_i32 = arith.constant 0 : i32
    %c0_i32_0 = arith.constant 0 : i32
    %c0_i32_1 = arith.constant 0 : i32
    return %c0_i32, %c0_i32_0 : i32, i32
  }
  func.func @transform_2(%arg0: i32) -> (i32, i32) {
    %c0_i32 = arith.constant 0 : i32
    %c0_i32_0 = arith.constant 0 : i32
    return %c0_i32, %arg0 : i32, i32
  }
  func.func @transform_3(%arg0: i32) -> (i32, i32) {
    %c0_i32 = arith.constant 0 : i32
    %c0_i32_0 = arith.constant 0 : i32
    return %c0_i32, %arg0 : i32, i32
  }
}

</mosaic_0001>

<bundles_post_ra>
// kernel: _transposed_linear_impl.1
= control target key start
LH: loop header
LB: loop body
LE: loop exit
PB: predicated region body
PF: predicated region fallthrough
CT: control target
= control target key end

     0   :  { %8 = vsyncpa [#allocation3], 0  ;;  %s293_s0 = inlined_call_operand.vmem [shape: f32[16,32], index: 0, kind: input, shape index: {}]   ;;  %s294_s1 = inlined_call_operand.vmem [shape: f32[16,1], index: 1, kind: input, shape index: {}]   ;;  %s295_s2 = inlined_call_operand.hbm [shape: f32[32,256], index: 2, kind: input, shape index: {}]   ;;  %s296_s3 = inlined_call_operand.hbm [shape: f32[16,256], index: 3, kind: output, shape index: {}]  }
   0x1   :  { %9 = vsyncpa [#allocation4], 0  ;;  %s225_s12 = smov [#allocation2]   ;;  %s177_s16 = scalar_lea.hbm %s295_s2, 1024 }
   0x2   :  { %s19_s13 = sshll.u32 %s225_s12, 4  ;;  %p178_p0 = scmp.ne.s32.totalorder %s295_s2, %s177_s16  ;;  %s20_s13 = int_to_ptr.vmem [resolvable:$true] %s19_s13 }
   0x3   :  { %p181_p1 = scmp.lt.u32.totalorder %s177_s16, %s295_s2 }
   0x5   :  { %p183_p2 = pnand %p181_p1, %p178_p0 }
   0x7   :  { %186 = shalt.err (!%p183_p2)
}
   0x8   :  { %s187_s21 = scalar_lea.vmem %s20_s13, 1024  ;;  %p192_p4 = scmp.lt.s32.totalorder %s20_s13, %s20_s13 }
   0x9   :  { %p188_p3 = scmp.ne.s32.totalorder %s20_s13, %s187_s21  ;;  %p193_p5 = scmp.lt.s32.totalorder %s187_s21, %s187_s21 }
   0xb   :  { %p194_p6 = por %p193_p5, %p192_p4 }
   0xd   :  { %p195_p7 = pnand %p194_p6, %p188_p3 }
   0xf   :  { %198 = shalt.err (!%p195_p7)
}
  0x10   :  { %s226_s22 = smov 256   ;;  %s227_s23 = smov 16  }
  0x11   :  { %25 = dma.hbm_to_vmem [thread:$0]  %s295_s2, 1024, %s20_s13, [#allocation3], %s226_s22, %s226_s22, %s227_s23  }
  0x12   :  { %221 = dma.done.wait [#allocation3], 1024  }
  0x13   :  { %222 = vsyncadd [#allocation3], 4294966272  ;;  %v228_v0 = vmov 0.0   ;;  %v229_v1 = vmov 0   ;;  %v32_v2 = vld [vmem:[#allocation2 + $0x8] sm:$0xff]  ;;  %v34_v3 = vld [vmem:[#allocation2 + $0x18] sm:$0xff] }
  0x14   :  { %122 = vmatprep.mubr.f32.mxu0 %v228_v0  ;;  %128 = vmatprep.mubr.f32.mxu1 %v228_v0  ;;  %v31_v4 = vld [vmem:[#allocation2] sm:$0xff]  ;;  %v158_v5 = vpack.c.bf16 %v34_v3, %v32_v2  ;;  %v33_v6 = vld [vmem:[#allocation2 + $0x10] sm:$0xff]  ;;  %v36_v7 = vld [vmem:[#allocation2 + $0x28] sm:$0xff]  ;;  %vm51_vm0 = vcmask 261120   ;;  %s230_s6 = smov [#allocation5]  }
  0x15   :  { %176 = vset.pattern.permute.xlu0 %v229_v1  ;;  %v38_v8 = vld [vmem:[#allocation2 + $0x38] sm:$0xff]  ;;  %v160_v9 = vpack.c.bf16 %v33_v6, %v31_v4  ;;  %v35_v11 = vld [vmem:[#allocation2 + $0x20] sm:$0xff]  ;;  %v37_v12 = vld [vmem:[#allocation2 + $0x30] sm:$0xff]  ;;  %s144_s7 = sshll.u32 %s230_s6, 4  ;;  %s145_s7 = int_to_ptr.vmem [resolvable:$true] %s144_s7 }
  0x16   :  { %v162_v10 = vpack.c.bf16 %v38_v8, %v36_v7  ;;  %159 = vmatprep.subr.bf16.mxu0 %v158_v5  ;;  %166 = vmatprep.subr.bf16.mxu1 %v158_v5  ;;  %v39_v13 = vld [vmem:[%s294_s1] sm:$0xff]  ;;  %v164_v14 = vpack.c.bf16 %v37_v12, %v35_v11  ;;  %v40_v15 = vld [vmem:[%s294_s1 + $0x8] sm:$0xff]  ;;  %p204_p9 = scmp.lt.s32.totalorder %s145_s7, %s145_s7 }
  0x17   :  { %161 = vmatpush1.bf16.msra.mxu0 %v160_v9  ;;  %168 = vmatpush1.bf16.msra.mxu1 %v160_v9  ;;  %v29_v16 = vld [vmem:[%s293_s0] sm:$0xff]  ;;  %v30_v17 = vld [vmem:[%s293_s0 + $0x8] sm:$0xff]  ;;  %s199_s0 = scalar_lea.vmem %s145_s7, 512 }
  0x18   :  { %163 = vmatprep.subr.bf16.mxu0 %v162_v10  ;;  %167 = vmatprep.subr.bf16.mxu1 %v162_v10  ;;  %p200_p8 = scmp.ne.s32.totalorder %s145_s7, %s199_s0  ;;  %p205_p10 = scmp.lt.s32.totalorder %s199_s0, %s199_s0 }
  0x19   :  { %43 = vperm.xlu0 %176, %v39_v13  }
  0x1a   :  { %p206_p11 = por %p205_p10, %p204_p9 }
  0x1b   :  { %165 = vmatpush1.bf16.msra.mxu0 %v164_v14  ;;  %169 = vmatpush1.bf16.msra.mxu1 %v164_v14 }
  0x1c   :  { %p207_p12 = pnand %p206_p11, %p200_p8 }
  0x1d   :  { %48 = vperm.xlu0 %176, %v40_v15  }
  0x1e   :  { %156 = vmatmul.mubr.msk.f32.vlgmr.msra.gmra.mrb[0].mxu0 %vm51_vm0, %v29_v16  ;;  %157 = vmatmul.mubr.msk.f32.vlgmr.msra.gmra.mrb[0].mxu1 %vm51_vm0, %v30_v17 }
  0x98   :  { %v44_v18 = vpop.permute.xlu0 %43 }
  0x9c   :  { %v49_v19 = vpop.permute.xlu0 %48 }
  0xf1   :  { %v124_v20 = vpop.f32.mrb[0].mxu0  ;;  %v130_v21 = vpop.f32.mrb[0].mxu1 }
  0xf2   :  { %v125_v22 = vadd.f32 %v124_v20, %v44_v18  ;;  %v131_v23 = vadd.f32 %v130_v21, %v49_v19  ;;  %v126_v24 = vpop.f32.mrb[1].mxu0  ;;  %v132_v25 = vpop.f32.mrb[1].mxu1 }
  0xf3   :  { %v127_v26 = vadd.f32 %v126_v24, %v44_v18  ;;  %v133_v27 = vadd.f32 %v132_v25, %v49_v19 }
  0xf4   :  { %135 = vst [vmem:[#allocation5] sm:$0xff] %v125_v22  ;;  %137 = vst [vmem:[#allocation5 + $0x10] sm:$0xff] %v131_v23 }
  0xf5   :  { %136 = vst [vmem:[#allocation5 + $0x8] sm:$0xff] %v127_v26  ;;  %138 = vst [vmem:[#allocation5 + $0x18] sm:$0xff] %v133_v27 }
  0xf6   :  { %210 = shalt.err (!%p207_p12)
}
  0xf7   :  { %s211_s9 = scalar_lea.hbm %s296_s3, 512 }
  0xf8   :  { %p212_p13 = scmp.ne.s32.totalorder %s296_s3, %s211_s9  ;;  %p215_p0 = scmp.lt.u32.totalorder %s211_s9, %s296_s3 }
  0xfa   :  { %p217_p1 = pnand %p215_p0, %p212_p13 }
  0xfc   :  { %220 = shalt.err (!%p217_p1)
}
  0xfd   :  { %150 = dma.vmem_to_hbm [thread:$0]  %s145_s7, 512, %s296_s3, [#allocation4], %s226_s22, %s226_s22, %s227_s23  }
  0xfe   :  { %223 = dma.done.wait [#allocation4], 512  }
  0xff   :  { %224 = vsyncadd [#allocation4], 4294966784 }
 0x100   :  { %154 = vsyncpa [#allocation3], 1 }
 0x101   :  { %155 = vsyncpa [#allocation4], 1 }

</bundles_post_ra>
